<compile_context>
chip_gen: v6e
topology: v6e:2x2x1
jax: 0.10.0
libtpu: 0.0.40
codegen_flags: <defaults>
</compile_context>

<pallas_src>
import jax
import jax.numpy as jnp
from jax.experimental import pallas as pl
from jax.experimental.pallas import tpu as pltpu

LANES = 128
SUBLANES = 8
ROW_CHUNK = 512        # rows per in-kernel compute chunk: 512*128*4B = 256 KiB temporaries


def _cdiv(a, b):
    return -(-a // b)


def _device_tile_rows_and_cores():
    """Generation-aware (default tile rows, TensorCores per chip)."""
    try:
        kind = jax.devices()[0].device_kind.lower()
    except Exception:
        kind = ""
    if "v7" in kind or "tpu7" in kind:
        # v7x: 2 TCs/chip, 32 MiB default scoped VMEM (64 MiB physical).
        return 8192, 2
    if "v6" in kind:
        # v6e: 1 TC, 32 MiB default scoped VMEM.
        return 8192, 1
    # v5e (16 MiB default scoped VMEM) and anything unknown: conservative.
    return 4096, 1


def _make_dice_kernel(tile_rows, chunk_rows, rows, n_red, need_mask):
    n_chunks = tile_rows // chunk_rows
    groups = chunk_rows // SUBLANES

    def kernel(x_ref, t_ref, out_ref):
        r = pl.program_id(1)

        @pl.when(r == 0)
        def _init():
            out_ref[...] = jnp.zeros_like(out_ref)

        # NOTE: int32 row arithmetic; only overflows past ~2^31 rows (~2.7e11
        # elements), far beyond any realistic segmentation tensor.
        tile_row0 = (pl.program_id(0) * n_red + r) * tile_rows

        def chunk_body(c, carry):
            inter_acc, both_acc = carry
            row0 = c * chunk_rows
            if n_chunks > 1:
                row0 = pl.multiple_of(row0, chunk_rows)
            x = x_ref[pl.ds(row0, chunk_rows), :].astype(jnp.float32)
            t = t_ref[pl.ds(row0, chunk_rows), :].astype(jnp.float32)
            if need_mask:
                row_ids = tile_row0 + row0 + jax.lax.broadcasted_iota(
                    jnp.int32, (chunk_rows, 1), 0)
                valid = row_ids < rows
                # Select (not multiply) so stale-VMEM NaNs in padded rows of a
                # partial edge block cannot propagate.
                x = jnp.where(valid, x, 0.0)
                t = jnp.where(valid, t, 0.0)
            # The (groups, 8, 128) reshape keeps the native (8, 128) tiling, so
            # the axis-0 reduce is plain VPU vector adds (no cross-lane work).
            inter_acc = inter_acc + jnp.sum(
                (x * t).reshape(groups, SUBLANES, LANES), axis=0)
            both_acc = both_acc + jnp.sum(
                (x + t).reshape(groups, SUBLANES, LANES), axis=0)
            return inter_acc, both_acc

        zeros = jnp.zeros((SUBLANES, LANES), jnp.float32)
        if n_chunks == 1:
            inter, both = chunk_body(0, (zeros, zeros))
        else:
            inter, both = jax.lax.fori_loop(0, n_chunks, chunk_body,
                                            (zeros, zeros))
        out_ref[0, 0, :, :] += inter
        out_ref[0, 1, :, :] += both

    return kernel


def dice_loss(inputs, targets, smooth=1.0):
    assert inputs.shape == targets.shape
    x = inputs.reshape(-1)            # free flatten of a contiguous tensor
    t = targets.reshape(-1)
    n = x.shape[0]

    row_block = SUBLANES * LANES      # 1024 elements -> rows stays a multiple of 8
    n_main = (n // row_block) * row_block
    rows = n_main // LANES

    # Ragged tail (< 1024 elements): reduced with plain jnp on tiny slices
    # instead of jnp.pad-ing both full tensors (saves a full HBM copy pass).
    if n_main < n:
        xt = x[n_main:].astype(jnp.float32)
        tt = t[n_main:].astype(jnp.float32)
        tail_inter = jnp.sum(xt * tt)
        tail_both = jnp.sum(xt) + jnp.sum(tt)
        # TODO(synk): for ragged n the prefix reshape below may still cost one
        # copy; a fully copy-free path needs manual DMA from a 1-D pl.ANY ref.
    else:
        tail_inter = jnp.float32(0.0)
        tail_both = jnp.float32(0.0)

    if rows == 0:
        intersection = tail_inter
        total = tail_both
    else:
        x2 = x[:n_main].reshape(rows, LANES)
        t2 = t[:n_main].reshape(rows, LANES)

        default_tile_rows, n_cores = _device_tile_rows_and_cores()
        if rows <= ROW_CHUNK:
            chunk_rows = rows
            tile_rows = rows
        else:
            chunk_rows = ROW_CHUNK
            tile_rows = min(default_tile_rows, (rows // ROW_CHUNK) * ROW_CHUNK)

        num_tiles = _cdiv(rows, tile_rows)
        # Only split the grid across chips with >1 TensorCore (v7x); on 1-TC
        # chips a second "parallel" slice is pure overhead.
        n_par = n_cores if (n_cores > 1 and num_tiles >= n_cores) else 1
        n_red = _cdiv(num_tiles, n_par)
        phantom = (n_par * n_red != num_tiles)
        need_mask = (rows % tile_rows != 0) or phantom

        if phantom:
            def in_index(p, r):
                # Phantom tiles clamp onto the last real tile; the kernel masks
                # all their rows (row id >= rows) to zero.
                return (jnp.minimum(p * n_red + r, num_tiles - 1), 0)
        else:
            def in_index(p, r):
                return (p * n_red + r, 0)

        kernel = _make_dice_kernel(tile_rows, chunk_rows, rows, n_red, need_mask)

        partials = pl.pallas_call(
            kernel,
            out_shape=jax.ShapeDtypeStruct(
                (n_par, 2, SUBLANES, LANES), jnp.float32),
            grid_spec=pltpu.PrefetchScalarGridSpec(
                num_scalar_prefetch=0,
                grid=(n_par, n_red),
                in_specs=[
                    pl.BlockSpec((tile_rows, LANES), in_index),
                    pl.BlockSpec((tile_rows, LANES), in_index),
                ],
                out_specs=pl.BlockSpec(
                    (1, 2, SUBLANES, LANES), lambda p, r: (p, 0, 0, 0)),
            ),
            compiler_params=pltpu.CompilerParams(
                dimension_semantics=("parallel", "arbitrary"),
            ),
        )(x2, t2)

        sums = jnp.sum(partials, axis=(0, 2, 3))   # [sum(x*t), sum(x)+sum(t)]
        intersection = sums[0] + tail_inter
        total = sums[1] + tail_both

    dice = (2.0 * intersection + smooth) / (total + smooth)
    return 1.0 - dice


def dice_loss_ref(inputs, targets, smooth=1.0):
    x = inputs.reshape(-1).astype(jnp.float32)
    t = targets.reshape(-1).astype(jnp.float32)
    inter = jnp.sum(x * t)
    dice = (2.0 * inter + smooth) / (jnp.sum(x) + jnp.sum(t) + smooth)
    return 1.0 - dice


if __name__ == "__main__":
    key = jax.random.PRNGKey(0)
    k1, k2, k3, k4, k5, k6 = jax.random.split(key, 6)

    # Small NCHW case matching the UNet usage: sigmoid prediction + binary mask.
    inputs = jax.nn.sigmoid(jax.random.normal(k1, (2, 4, 16, 16), jnp.float32))
    targets = (jax.random.uniform(k2, (2, 4, 16, 16)) > 0.5).astype(jnp.float32)
    loss = jax.block_until_ready(dice_loss(inputs, targets))
    ref = jax.block_until_ready(dice_loss_ref(inputs, targets))
    assert jnp.allclose(loss, ref, atol=2e-5, rtol=1e-5), (loss, ref)

    # Larger case: multi-tile grid, masked partial last tile, chunked in-kernel
    # reduction loop, non-default smooth, narrower target dtype.
    inputs2 = jax.nn.sigmoid(jax.random.normal(k3, (2, 4, 192, 192), jnp.float32))
    targets2 = (jax.random.uniform(k4, (2, 4, 192, 192)) > 0.5).astype(jnp.bfloat16)
    loss2 = jax.block_until_ready(dice_loss(inputs2, targets2, smooth=2.0))
    ref2 = jax.block_until_ready(dice_loss_ref(inputs2, targets2, smooth=2.0))
    assert jnp.allclose(loss2, ref2, atol=2e-5, rtol=1e-5), (loss2, ref2)

    # Ragged element count: exercises the pad-free wrapper-side tail reduction.
    inputs3 = jax.nn.sigmoid(jax.random.normal(k5, (2, 3, 21, 17), jnp.float32))
    targets3 = (jax.random.uniform(k6, (2, 3, 21, 17)) > 0.5).astype(jnp.float32)
    loss3 = jax.block_until_ready(dice_loss(inputs3, targets3))
    ref3 = jax.block_until_ready(dice_loss_ref(inputs3, targets3))
    assert jnp.allclose(loss3, ref3, atol=2e-5, rtol=1e-5), (loss3, ref3)

    print("KERNEL_OK")
</pallas_src>

<mosaic_0001>
module attributes {stable_mosaic.version = 11 : i64} {
  func.func @kernel(%arg0: i32, %arg1: i32, %arg2: memref<16x128xf32, #tpu.memory_space<vmem>>, %arg3: memref<16x128xf32, #tpu.memory_space<vmem>>, %arg4: memref<1x2x8x128xf32, #tpu.memory_space<vmem>>) attributes {dimension_semantics = [#tpu.dimension_semantics<parallel>, #tpu.dimension_semantics<arbitrary>], iteration_bounds = array<i64: 1, 1>, scalar_prefetch = 0 : i64, scratch_operands = 0 : i64, tpu.core_type = #tpu.core_type<tc>, window_params = [{transform_indices = @transform_0, window_bounds = array<i64: 16, 128>}, {transform_indices = @transform_1, window_bounds = array<i64: 16, 128>}, {transform_indices = @transform_2, window_bounds = array<i64: 1, 2, 8, 128>}]} {
    %c0_i32 = arith.constant 0 : i32
    %0 = arith.cmpi eq, %arg1, %c0_i32 : i32
    %1 = arith.extui %0 : i1 to i32
    %c0_i32_0 = arith.constant 0 : i32
    %2 = arith.cmpi ne, %1, %c0_i32_0 : i32
    scf.if %2 {
      %cst_21 = arith.constant 0.000000e+00 : f32
      %26 = vector.broadcast %cst_21 : f32 to vector<1x2x8x128xf32>
      %c0_22 = arith.constant 0 : index
      %c0_23 = arith.constant 0 : index
      %c0_24 = arith.constant 0 : index
      %c0_25 = arith.constant 0 : index
      %27 = vector.load %arg4[%c0_22, %c0_23, %c0_24, %c0_25] : memref<1x2x8x128xf32, #tpu.memory_space<vmem>>, vector<1x2x8x128xf32>
      tpu.vector_store %arg4[%c0_22, %c0_23, %c0_24, %c0_25], %26 {strides = array<i32>} : memref<1x2x8x128xf32, #tpu.memory_space<vmem>>, vector<1x2x8x128xf32>,
    } else {
    }
    %cst = arith.constant 0.000000e+00 : f32
    %3 = vector.broadcast %cst : f32 to vector<8x128xf32>
    %c0 = arith.constant 0 : index
    %c0_1 = arith.constant 0 : index
    %4 = vector.load %arg2[%c0, %c0_1] : memref<16x128xf32, #tpu.memory_space<vmem>>, vector<16x128xf32>
    %c0_2 = arith.constant 0 : index
    %c0_3 = arith.constant 0 : index
    %5 = vector.load %arg3[%c0_2, %c0_3] : memref<16x128xf32, #tpu.memory_space<vmem>>, vector<16x128xf32>
    %6 = arith.mulf %4, %5 : vector<16x128xf32>
    %7 = vector.shape_cast %6 : vector<16x128xf32> to vector<2x8x128xf32>
    %cst_4 = arith.constant dense<0.000000e+00> : vector<8x128xf32>
    %8 = vector.multi_reduction <add>, %7, %cst_4 [0] : vector<2x8x128xf32> to vector<8x128xf32>
    %9 = arith.addf %3, %8 : vector<8x128xf32>
    %10 = arith.addf %4, %5 : vector<16x128xf32>
    %11 = vector.shape_cast %10 : vector<16x128xf32> to vector<2x8x128xf32>
    %cst_5 = arith.constant dense<0.000000e+00> : vector<8x128xf32>
    %12 = vector.multi_reduction <add>, %11, %cst_5 [0] : vector<2x8x128xf32> to vector<8x128xf32>
    %13 = arith.addf %3, %12 : vector<8x128xf32>
    %c0_6 = arith.constant 0 : index
    %c0_7 = arith.constant 0 : index
    %c0_8 = arith.constant 0 : index
    %c0_9 = arith.constant 0 : index
    %14 = vector.load %arg4[%c0_6, %c0_7, %c0_8, %c0_9] : memref<1x2x8x128xf32, #tpu.memory_space<vmem>>, vector<1x1x8x128xf32>
    %15 = vector.shape_cast %14 : vector<1x1x8x128xf32> to vector<8x128xf32>
    %16 = arith.addf %15, %9 : vector<8x128xf32>
    %c0_10 = arith.constant 0 : index
    %c0_11 = arith.constant 0 : index
    %c0_12 = arith.constant 0 : index
    %c0_13 = arith.constant 0 : index
    %17 = vector.load %arg4[%c0_10, %c0_11, %c0_12, %c0_13] : memref<1x2x8x128xf32, #tpu.memory_space<vmem>>, vector<1x1x8x128xf32>
    %18 = vector.shape_cast %17 : vector<1x1x8x128xf32> to vector<8x128xf32>
    %19 = vector.shape_cast %16 : vector<8x128xf32> to vector<1x1x8x128xf32>
    tpu.vector_store %arg4[%c0_10, %c0_11, %c0_12, %c0_13], %19 {strides = array<i32>} : memref<1x2x8x128xf32, #tpu.memory_space<vmem>>, vector<1x1x8x128xf32>,
    %c0_14 = arith.constant 0 : index
    %c1 = arith.constant 1 : index
    %c0_15 = arith.constant 0 : index
    %c0_16 = arith.constant 0 : index
    %20 = vector.load %arg4[%c0_14, %c1, %c0_15, %c0_16] : memref<1x2x8x128xf32, #tpu.memory_space<vmem>>, vector<1x1x8x128xf32>
    %21 = vector.shape_cast %20 : vector<1x1x8x128xf32> to vector<8x128xf32>
    %22 = arith.addf %21, %13 : vector<8x128xf32>
    %c0_17 = arith.constant 0 : index
    %c1_18 = arith.constant 1 : index
    %c0_19 = arith.constant 0 : index
    %c0_20 = arith.constant 0 : index
    %23 = vector.load %arg4[%c0_17, %c1_18, %c0_19, %c0_20] : memref<1x2x8x128xf32, #tpu.memory_space<vmem>>, vector<1x1x8x128xf32>
    %24 = vector.shape_cast %23 : vector<1x1x8x128xf32> to vector<8x128xf32>
    %25 = vector.shape_cast %22 : vector<8x128xf32> to vector<1x1x8x128xf32>
    tpu.vector_store %arg4[%c0_17, %c1_18, %c0_19, %c0_20], %25 {strides = array<i32>} : memref<1x2x8x128xf32, #tpu.memory_space<vmem>>, vector<1x1x8x128xf32>,
    return
  }
  func.func @transform_0(%arg0: i32, %arg1: i32) -> (i32, i32) {
    %c1_i32 = arith.constant 1 : i32
    %0 = arith.muli %arg0, %c1_i32 : i32
    %1 = arith.addi %0, %arg1 : i32
    %c0_i32 = arith.constant 0 : i32
    %c0_i32_0 = arith.constant 0 : i32
    return %1, %c0_i32 : i32, i32
  }
  func.func @transform_1(%arg0: i32, %arg1: i32) -> (i32, i32) {
    %c1_i32 = arith.constant 1 : i32
    %0 = arith.muli %arg0, %c1_i32 : i32
    %1 = arith.addi %0, %arg1 : i32
    %c0_i32 = arith.constant 0 : i32
    %c0_i32_0 = arith.constant 0 : i32
    return %1, %c0_i32 : i32, i32
  }
  func.func @transform_2(%arg0: i32, %arg1: i32) -> (i32, i32, i32, i32) {
    %c0_i32 = arith.constant 0 : i32
    %c0_i32_0 = arith.constant 0 : i32
    %c0_i32_1 = arith.constant 0 : i32
    %c0_i32_2 = arith.constant 0 : i32
    return %arg0, %c0_i32, %c0_i32_0, %c0_i32_1 : i32, i32, i32, i32
  }
}

</mosaic_0001>

<bundles_post_ra>
// kernel: tpu_custom_call.1
= control target key start
LH: loop header
LB: loop body
LE: loop exit
PB: predicated region body
PF: predicated region fallthrough
CT: control target
= control target key end

     0   :  { %7 = vsyncpa [#allocation3], 0  ;;  %s205_s0 = inlined_call_operand.hbm [shape: f32[16,128], index: 0, kind: input, shape index: {}]   ;;  %s206_s1 = inlined_call_operand.hbm [shape: f32[16,128], index: 1, kind: input, shape index: {}]   ;;  %s207_s2 = inlined_call_operand.hbm [shape: f32[1,2,8,128], index: 2, kind: output, shape index: {}]  }
   0x1   :  { %8 = vsyncpa [#allocation6], 0 }
   0x2   :  { %9 = vsyncpa [#allocation4], 0  ;;  %s167_s9 = smov [#allocation2]  }
   0x3   :  { %s19_s10 = sshll.u32 %s167_s9, 4  ;;  %s20_s10 = int_to_ptr.vmem [resolvable:$true] %s19_s10 }
   0x4   :  { %s109_s11 = scalar_lea.vmem %s20_s10, 256  ;;  %p114_p1 = scmp.lt.s32.totalorder %s20_s10, %s20_s10 }
   0x5   :  { %p110_p0 = scmp.ne.s32.totalorder %s20_s10, %s109_s11  ;;  %p115_p2 = scmp.lt.s32.totalorder %s109_s11, %s109_s11 }
   0x7   :  { %p116_p3 = por %p115_p2, %p114_p1 }
   0x9   :  { %p117_p4 = pnand %p116_p3, %p110_p0 }
   0xb   :  { %120 = shalt.err (!%p117_p4)
}
   0xc   :  { %s168_s12 = smov 128   ;;  %s169_s13 = smov 8  }
   0xd   :  { %25 = dma.hbm_to_vmem [thread:$0]  %s205_s0, 256, %s20_s10, [#allocation3], %s168_s12, %s168_s12, %s169_s13  }
   0xe   :  { %s170_s16 = smov [#allocation5]  }
   0xf   :  { %s35_s17 = sshll.u32 %s170_s16, 4  ;;  %s36_s17 = int_to_ptr.vmem [resolvable:$true] %s35_s17 }
  0x10   :  { %s129_s18 = scalar_lea.vmem %s36_s17, 256  ;;  %p134_p6 = scmp.lt.s32.totalorder %s36_s17, %s36_s17 }
  0x11   :  { %p130_p5 = scmp.ne.s32.totalorder %s36_s17, %s129_s18  ;;  %p135_p7 = scmp.lt.s32.totalorder %s129_s18, %s129_s18 }
  0x13   :  { %p136_p8 = por %p135_p7, %p134_p6 }
  0x15   :  { %p137_p9 = pnand %p136_p8, %p130_p5 }
  0x17   :  { %140 = shalt.err (!%p137_p9)
}
  0x18   :  { %41 = dma.hbm_to_vmem [thread:$0]  %s206_s1, 256, %s36_s17, [#allocation6], %s168_s12, %s168_s12, %s169_s13  }
  0x19   :  { %161 = dma.done.wait [#allocation3], 256  }
  0x1a   :  { %162 = vsyncadd [#allocation3], 4294967040 }
  0x1b   :  { %163 = dma.done.wait [#allocation6], 256  }
  0x1c   :  { %164 = vsyncadd [#allocation6], 4294967040  ;;  %v58_v0 = vld [vmem:[#allocation2] sm:$0xff]  ;;  %v59_v1 = vld [vmem:[#allocation2 + $0x8] sm:$0xff]  ;;  %s171_s0 = smov [#allocation7]  }
  0x1d   :  { %v60_v2 = vld [vmem:[#allocation5] sm:$0xff]  ;;  %v61_v3 = vld [vmem:[#allocation5 + $0x8] sm:$0xff]  ;;  %s82_s21 = sshll.u32 %s171_s0, 4  ;;  %s83_s21 = int_to_ptr.vmem [resolvable:$true] %s82_s21 }
  0x1e   :  { %v62_v4 = vmul.f32 %v60_v2, %v58_v0  ;;  %v66_v5 = vadd.f32 %v60_v2, %v58_v0  ;;  %v63_v6 = vmul.f32 %v61_v3, %v59_v1  ;;  %v67_v7 = vadd.f32 %v61_v3, %v59_v1  ;;  %s141_s1 = scalar_lea.vmem %s83_s21, 256  ;;  %p146_p11 = scmp.lt.s32.totalorder %s83_s21, %s83_s21 }
  0x1f   :  { %p142_p10 = scmp.ne.s32.totalorder %s83_s21, %s141_s1  ;;  %p147_p12 = scmp.lt.s32.totalorder %s141_s1, %s141_s1 }
  0x20   :  { %v64_v8 = vadd.f32 %v63_v6, %v62_v4  ;;  %v68_v9 = vadd.f32 %v67_v7, %v66_v5 }
  0x21   :  { %p148_p13 = por %p147_p12, %p146_p11 }
  0x22   :  { %72 = vst [vmem:[#allocation7] sm:$0xff] %v64_v8  ;;  %76 = vst [vmem:[#allocation7 + $0x8] sm:$0xff] %v68_v9 }
  0x23   :  { %p149_p0 = pnand %p148_p13, %p142_p10 }
  0x25   :  { %152 = shalt.err (!%p149_p0)
}
  0x26   :  { %88 = dma.vmem_to_hbm [thread:$0]  %s83_s21, 256, %s207_s2, [#allocation4], %s168_s12, %s168_s12, %s169_s13  }
  0x27   :  { %165 = dma.done.wait [#allocation4], 256  }
  0x28   :  { %166 = vsyncadd [#allocation4], 4294967040 }
  0x29   :  { %92 = vsyncpa [#allocation3], 1 }
  0x2a   :  { %93 = vsyncpa [#allocation6], 1 }
  0x2b   :  { %94 = vsyncpa [#allocation4], 1 }

</bundles_post_ra>
